<compile_context>
chip_gen: v7x
topology: tpu7x:2x2x1
jax: 0.10.0
libtpu: 0.0.40
codegen_flags: <defaults>
</compile_context>

<pallas_src>
import jax
import jax.numpy as jnp
import numpy as np
from jax import lax
from jax.experimental import pallas as pl
from jax.experimental.pallas import tpu as pltpu

N, CIN, H, W = 2, 4, 16, 16
COUT = CIN          # in_ch == out_ch
KH = KW = 3
EPS = 1e-5          # nn.BatchNorm2d default
HW = H * W          # 256 pixels per (image, channel) row -> lane axis (2x128)
NC = N * CIN        # 8 rows -> full sublane extent of one vreg
CNT = N * H * W     # BatchNorm count per channel


def skipblock_kernel(x_ref, w_ref, g_ref, bt_ref, o_ref):
    # Layout: rows = (image, channel) pairs (sublanes), cols = H*W pixels (lanes).
    x = x_ref[...]                            # (NC, HW) f32, stays in vregs
    w_bd = w_ref[...]                         # (NC, 9*NC) block-diagonal weight
    gamma = g_ref[...]                        # (CIN, 1)
    beta = bt_ref[...]                        # (CIN, 1)

    # Hoisted per-tap validity masks (conv zero padding), shared by both convs.
    # pos = h*W + w ; H, W are powers of two -> shifts/ands only.
    pos = lax.broadcasted_iota(jnp.int32, (NC, HW), 1)
    w_idx = jnp.bitwise_and(pos, W - 1)                       # w
    h_idx = jnp.bitwise_and(jnp.right_shift(pos, 4), H - 1)   # h
    masks = []
    shifts = []
    for kh in range(KH):
        for kw in range(KW):
            hh = h_idx + (kh - 1)
            ww = w_idx + (kw - 1)
            masks.append((hh >= 0) & (hh < H) & (ww >= 0) & (ww < W))
            d = (kh - 1) * W + (kw - 1)       # flattened pixel offset of tap
            shifts.append((-d) % HW)          # tap[p] = src[p + d] via roll

    def conv3x3(src):
        """src: (NC, HW) value -> conv(src) as a (NC, HW) value.

        Conv bias is intentionally omitted: it is cancelled exactly by the
        training-mode BatchNorm mean subtraction that immediately follows.
        """
        taps = []
        for k in range(KH * KW):
            # In-register shifted view (XLU roll); wrap positions are masked.
            t = src if shifts[k] == 0 else pltpu.roll(src, shift=shifts[k], axis=1)
            taps.append(jnp.where(masks[k], t, 0.0))
        stacked = jnp.concatenate(taps, axis=0)          # (9*NC, HW)
        # Single MXU call: block-diagonal (NC, 9*NC) @ (9*NC, HW) does the
        # channel mixing for all 9 taps and all N images at once.
        return jnp.dot(w_bd, stacked, preferred_element_type=jnp.float32)

    inv_cnt = 1.0 / float(CNT)

    def bn_relu(v):
        """Training-mode BatchNorm2d (batch stats, biased var) + ReLU, fused."""
        both = jnp.concatenate([v, v * v], axis=0)        # (2*NC, HW)
        rs = jnp.sum(both, axis=1, keepdims=True)         # single reduction pass
        # Fold per-image partial sums into per-channel sums.
        s = rs[0:CIN]
        ss = rs[NC:NC + CIN]
        for n in range(1, N):
            s = s + rs[n * CIN:(n + 1) * CIN]
            ss = ss + rs[NC + n * CIN:NC + (n + 1) * CIN]
        mean = s * inv_cnt
        var = jnp.maximum(ss * inv_cnt - mean * mean, 0.0)   # biased, clamped
        scale = gamma * lax.rsqrt(var + EPS)               # (CIN, 1)
        shift = beta - mean * scale
        scale_r = jnp.concatenate([scale] * N, axis=0)     # (NC, 1) per-row
        shift_r = jnp.concatenate([shift] * N, axis=0)
        return jnp.maximum(v * scale_r + shift_r, 0.0)

    out = bn_relu(conv3x3(x))        # out = relu(bn(convo(x)))
    out = bn_relu(conv3x3(out))      # in_ch == out_ch: reuse same conv / bn
    o_ref[...] = out + x             # skip connection, dense (8, 256) store


def skip_block(x, w_oihw, b, gamma, beta):
    del b  # cancelled by training-mode BatchNorm mean subtraction (see kernel)
    # Transpose-free activation layout: plain reshape of contiguous NCHW.
    x2d = x.reshape(NC, HW).astype(jnp.float32)

    # Per-tap weights w9[k, o, c] = w[o, c, kh, kw]; build a block-diagonal
    # (N*COUT, 9*N*CIN) matrix so one matmul covers all images and taps.
    w9 = jnp.transpose(w_oihw.reshape(COUT, CIN, KH * KW), (2, 0, 1))
    eye = jnp.eye(N, dtype=jnp.float32)
    w_bd = jnp.einsum('pq,koc->pokqc', eye, w9).reshape(
        N * COUT, KH * KW * N * CIN).astype(jnp.float32)         # (8, 72)

    out2d = pl.pallas_call(
        skipblock_kernel,
        out_shape=jax.ShapeDtypeStruct((NC, HW), jnp.float32),
        in_specs=[
            pl.BlockSpec(memory_space=pltpu.MemorySpace.VMEM),   # x     (8, 256)
            pl.BlockSpec(memory_space=pltpu.MemorySpace.VMEM),   # w_bd  (8, 72)
            pl.BlockSpec(memory_space=pltpu.MemorySpace.VMEM),   # gamma (4, 1)
            pl.BlockSpec(memory_space=pltpu.MemorySpace.VMEM),   # beta  (4, 1)
        ],
        out_specs=pl.BlockSpec(memory_space=pltpu.MemorySpace.VMEM),
    )(x2d, w_bd,
      gamma.reshape(CIN, 1).astype(jnp.float32),
      beta.reshape(CIN, 1).astype(jnp.float32))

    # Transpose-free output: rows are already (n, c)-ordered.
    return out2d.reshape(N, COUT, H, W)


def skip_block_reference(x, w_oihw, b, gamma, beta):
    """Pure-JAX reference mirroring the PyTorch forward (training-mode BN)."""
    def conv(v):
        y = lax.conv_general_dilated(
            v, w_oihw, window_strides=(1, 1), padding=((1, 1), (1, 1)),
            dimension_numbers=("NCHW", "OIHW", "NCHW"))
        return y + b.reshape(1, -1, 1, 1)

    def bn_relu(v):
        mean = v.mean(axis=(0, 2, 3), keepdims=True)
        var = ((v - mean) ** 2).mean(axis=(0, 2, 3), keepdims=True)
        y = (v - mean) / jnp.sqrt(var + EPS)
        y = y * gamma.reshape(1, -1, 1, 1) + beta.reshape(1, -1, 1, 1)
        return jnp.maximum(y, 0.0)

    out = bn_relu(conv(x))
    out = bn_relu(conv(out))
    return out + x


if __name__ == "__main__":
    key = jax.random.PRNGKey(0)
    kx, kw, kb, kg, kbeta = jax.random.split(key, 5)

    x = jax.random.normal(kx, (N, CIN, H, W), dtype=jnp.float32)
    w = 0.1 * jax.random.normal(kw, (COUT, CIN, KH, KW), dtype=jnp.float32)
    b = 0.1 * jax.random.normal(kb, (COUT,), dtype=jnp.float32)
    gamma = 1.0 + 0.1 * jax.random.normal(kg, (COUT,), dtype=jnp.float32)
    beta = 0.1 * jax.random.normal(kbeta, (COUT,), dtype=jnp.float32)

    out = skip_block(x, w, b, gamma, beta)
    out = jax.block_until_ready(out)

    ref = skip_block_reference(x, w, b, gamma, beta)
    np.testing.assert_allclose(np.asarray(out), np.asarray(ref),
                               rtol=1e-4, atol=1e-4)
    print("KERNEL_OK")
</pallas_src>

<mosaic_0001>
module attributes {stable_mosaic.version = 11 : i64} {
  func.func @skipblock_kernel(%arg0: memref<8x256xf32, #tpu.memory_space<vmem>>, %arg1: memref<8x72xf32, #tpu.memory_space<vmem>>, %arg2: memref<4x1xf32, #tpu.memory_space<vmem>>, %arg3: memref<4x1xf32, #tpu.memory_space<vmem>>, %arg4: memref<8x256xf32, #tpu.memory_space<vmem>>) attributes {dimension_semantics = [], scalar_prefetch = 0 : i64, scratch_operands = 0 : i64, tpu.core_type = #tpu.core_type<tc>} {
    %c0 = arith.constant 0 : index
    %c0_0 = arith.constant 0 : index
    %0 = vector.load %arg0[%c0, %c0_0] : memref<8x256xf32, #tpu.memory_space<vmem>>, vector<8x256xf32>
    %c0_1 = arith.constant 0 : index
    %c0_2 = arith.constant 0 : index
    %1 = vector.load %arg1[%c0_1, %c0_2] : memref<8x72xf32, #tpu.memory_space<vmem>>, vector<8x72xf32>
    %c0_3 = arith.constant 0 : index
    %c0_4 = arith.constant 0 : index
    %2 = vector.load %arg2[%c0_3, %c0_4] : memref<4x1xf32, #tpu.memory_space<vmem>>, vector<4x1xf32>
    %c0_5 = arith.constant 0 : index
    %c0_6 = arith.constant 0 : index
    %3 = vector.load %arg3[%c0_5, %c0_6] : memref<4x1xf32, #tpu.memory_space<vmem>>, vector<4x1xf32>
    %4 = tpu.iota {dimensions = array<i32: 1>} : vector<8x256xi32>
    %c15_i32 = arith.constant 15 : i32
    %5 = vector.broadcast %c15_i32 : i32 to vector<8x256xi32>
    %6 = arith.andi %4, %5 : vector<8x256xi32>
    %c4_i32 = arith.constant 4 : i32
    %7 = vector.broadcast %c4_i32 : i32 to vector<8x256xi32>
    %8 = arith.shrsi %4, %7 : vector<8x256xi32>
    %c15_i32_7 = arith.constant 15 : i32
    %9 = vector.broadcast %c15_i32_7 : i32 to vector<8x256xi32>
    %10 = arith.andi %8, %9 : vector<8x256xi32>
    %c-1_i32 = arith.constant -1 : i32
    %11 = vector.broadcast %c-1_i32 : i32 to vector<8x256xi32>
    %12 = arith.addi %10, %11 : vector<8x256xi32>
    %c-1_i32_8 = arith.constant -1 : i32
    %13 = vector.broadcast %c-1_i32_8 : i32 to vector<8x256xi32>
    %14 = arith.addi %6, %13 : vector<8x256xi32>
    %c0_i32 = arith.constant 0 : i32
    %15 = vector.broadcast %c0_i32 : i32 to vector<8x256xi32>
    %16 = arith.cmpi sge, %12, %15 : vector<8x256xi32>
    %c16_i32 = arith.constant 16 : i32
    %17 = vector.broadcast %c16_i32 : i32 to vector<8x256xi32>
    %18 = arith.cmpi slt, %12, %17 : vector<8x256xi32>
    %19 = arith.andi %16, %18 : vector<8x256xi1>
    %c0_i32_9 = arith.constant 0 : i32
    %20 = vector.broadcast %c0_i32_9 : i32 to vector<8x256xi32>
    %21 = arith.cmpi sge, %14, %20 : vector<8x256xi32>
    %22 = arith.andi %19, %21 : vector<8x256xi1>
    %c16_i32_10 = arith.constant 16 : i32
    %23 = vector.broadcast %c16_i32_10 : i32 to vector<8x256xi32>
    %24 = arith.cmpi slt, %14, %23 : vector<8x256xi32>
    %25 = arith.andi %22, %24 : vector<8x256xi1>
    %c-1_i32_11 = arith.constant -1 : i32
    %26 = vector.broadcast %c-1_i32_11 : i32 to vector<8x256xi32>
    %27 = arith.addi %10, %26 : vector<8x256xi32>
    %c0_i32_12 = arith.constant 0 : i32
    %28 = vector.broadcast %c0_i32_12 : i32 to vector<8x256xi32>
    %29 = arith.addi %6, %28 : vector<8x256xi32>
    %c0_i32_13 = arith.constant 0 : i32
    %30 = vector.broadcast %c0_i32_13 : i32 to vector<8x256xi32>
    %31 = arith.cmpi sge, %27, %30 : vector<8x256xi32>
    %c16_i32_14 = arith.constant 16 : i32
    %32 = vector.broadcast %c16_i32_14 : i32 to vector<8x256xi32>
    %33 = arith.cmpi slt, %27, %32 : vector<8x256xi32>
    %34 = arith.andi %31, %33 : vector<8x256xi1>
    %c0_i32_15 = arith.constant 0 : i32
    %35 = vector.broadcast %c0_i32_15 : i32 to vector<8x256xi32>
    %36 = arith.cmpi sge, %29, %35 : vector<8x256xi32>
    %37 = arith.andi %34, %36 : vector<8x256xi1>
    %c16_i32_16 = arith.constant 16 : i32
    %38 = vector.broadcast %c16_i32_16 : i32 to vector<8x256xi32>
    %39 = arith.cmpi slt, %29, %38 : vector<8x256xi32>
    %40 = arith.andi %37, %39 : vector<8x256xi1>
    %c-1_i32_17 = arith.constant -1 : i32
    %41 = vector.broadcast %c-1_i32_17 : i32 to vector<8x256xi32>
    %42 = arith.addi %10, %41 : vector<8x256xi32>
    %c1_i32 = arith.constant 1 : i32
    %43 = vector.broadcast %c1_i32 : i32 to vector<8x256xi32>
    %44 = arith.addi %6, %43 : vector<8x256xi32>
    %c0_i32_18 = arith.constant 0 : i32
    %45 = vector.broadcast %c0_i32_18 : i32 to vector<8x256xi32>
    %46 = arith.cmpi sge, %42, %45 : vector<8x256xi32>
    %c16_i32_19 = arith.constant 16 : i32
    %47 = vector.broadcast %c16_i32_19 : i32 to vector<8x256xi32>
    %48 = arith.cmpi slt, %42, %47 : vector<8x256xi32>
    %49 = arith.andi %46, %48 : vector<8x256xi1>
    %c0_i32_20 = arith.constant 0 : i32
    %50 = vector.broadcast %c0_i32_20 : i32 to vector<8x256xi32>
    %51 = arith.cmpi sge, %44, %50 : vector<8x256xi32>
    %52 = arith.andi %49, %51 : vector<8x256xi1>
    %c16_i32_21 = arith.constant 16 : i32
    %53 = vector.broadcast %c16_i32_21 : i32 to vector<8x256xi32>
    %54 = arith.cmpi slt, %44, %53 : vector<8x256xi32>
    %55 = arith.andi %52, %54 : vector<8x256xi1>
    %c0_i32_22 = arith.constant 0 : i32
    %56 = vector.broadcast %c0_i32_22 : i32 to vector<8x256xi32>
    %57 = arith.addi %10, %56 : vector<8x256xi32>
    %c-1_i32_23 = arith.constant -1 : i32
    %58 = vector.broadcast %c-1_i32_23 : i32 to vector<8x256xi32>
    %59 = arith.addi %6, %58 : vector<8x256xi32>
    %c0_i32_24 = arith.constant 0 : i32
    %60 = vector.broadcast %c0_i32_24 : i32 to vector<8x256xi32>
    %61 = arith.cmpi sge, %57, %60 : vector<8x256xi32>
    %c16_i32_25 = arith.constant 16 : i32
    %62 = vector.broadcast %c16_i32_25 : i32 to vector<8x256xi32>
    %63 = arith.cmpi slt, %57, %62 : vector<8x256xi32>
    %64 = arith.andi %61, %63 : vector<8x256xi1>
    %c0_i32_26 = arith.constant 0 : i32
    %65 = vector.broadcast %c0_i32_26 : i32 to vector<8x256xi32>
    %66 = arith.cmpi sge, %59, %65 : vector<8x256xi32>
    %67 = arith.andi %64, %66 : vector<8x256xi1>
    %c16_i32_27 = arith.constant 16 : i32
    %68 = vector.broadcast %c16_i32_27 : i32 to vector<8x256xi32>
    %69 = arith.cmpi slt, %59, %68 : vector<8x256xi32>
    %70 = arith.andi %67, %69 : vector<8x256xi1>
    %c0_i32_28 = arith.constant 0 : i32
    %71 = vector.broadcast %c0_i32_28 : i32 to vector<8x256xi32>
    %72 = arith.addi %10, %71 : vector<8x256xi32>
    %c0_i32_29 = arith.constant 0 : i32
    %73 = vector.broadcast %c0_i32_29 : i32 to vector<8x256xi32>
    %74 = arith.addi %6, %73 : vector<8x256xi32>
    %c0_i32_30 = arith.constant 0 : i32
    %75 = vector.broadcast %c0_i32_30 : i32 to vector<8x256xi32>
    %76 = arith.cmpi sge, %72, %75 : vector<8x256xi32>
    %c16_i32_31 = arith.constant 16 : i32
    %77 = vector.broadcast %c16_i32_31 : i32 to vector<8x256xi32>
    %78 = arith.cmpi slt, %72, %77 : vector<8x256xi32>
    %79 = arith.andi %76, %78 : vector<8x256xi1>
    %c0_i32_32 = arith.constant 0 : i32
    %80 = vector.broadcast %c0_i32_32 : i32 to vector<8x256xi32>
    %81 = arith.cmpi sge, %74, %80 : vector<8x256xi32>
    %82 = arith.andi %79, %81 : vector<8x256xi1>
    %c16_i32_33 = arith.constant 16 : i32
    %83 = vector.broadcast %c16_i32_33 : i32 to vector<8x256xi32>
    %84 = arith.cmpi slt, %74, %83 : vector<8x256xi32>
    %85 = arith.andi %82, %84 : vector<8x256xi1>
    %c0_i32_34 = arith.constant 0 : i32
    %86 = vector.broadcast %c0_i32_34 : i32 to vector<8x256xi32>
    %87 = arith.addi %10, %86 : vector<8x256xi32>
    %c1_i32_35 = arith.constant 1 : i32
    %88 = vector.broadcast %c1_i32_35 : i32 to vector<8x256xi32>
    %89 = arith.addi %6, %88 : vector<8x256xi32>
    %c0_i32_36 = arith.constant 0 : i32
    %90 = vector.broadcast %c0_i32_36 : i32 to vector<8x256xi32>
    %91 = arith.cmpi sge, %87, %90 : vector<8x256xi32>
    %c16_i32_37 = arith.constant 16 : i32
    %92 = vector.broadcast %c16_i32_37 : i32 to vector<8x256xi32>
    %93 = arith.cmpi slt, %87, %92 : vector<8x256xi32>
    %94 = arith.andi %91, %93 : vector<8x256xi1>
    %c0_i32_38 = arith.constant 0 : i32
    %95 = vector.broadcast %c0_i32_38 : i32 to vector<8x256xi32>
    %96 = arith.cmpi sge, %89, %95 : vector<8x256xi32>
    %97 = arith.andi %94, %96 : vector<8x256xi1>
    %c16_i32_39 = arith.constant 16 : i32
    %98 = vector.broadcast %c16_i32_39 : i32 to vector<8x256xi32>
    %99 = arith.cmpi slt, %89, %98 : vector<8x256xi32>
    %100 = arith.andi %97, %99 : vector<8x256xi1>
    %c1_i32_40 = arith.constant 1 : i32
    %101 = vector.broadcast %c1_i32_40 : i32 to vector<8x256xi32>
    %102 = arith.addi %10, %101 : vector<8x256xi32>
    %c-1_i32_41 = arith.constant -1 : i32
    %103 = vector.broadcast %c-1_i32_41 : i32 to vector<8x256xi32>
    %104 = arith.addi %6, %103 : vector<8x256xi32>
    %c0_i32_42 = arith.constant 0 : i32
    %105 = vector.broadcast %c0_i32_42 : i32 to vector<8x256xi32>
    %106 = arith.cmpi sge, %102, %105 : vector<8x256xi32>
    %c16_i32_43 = arith.constant 16 : i32
    %107 = vector.broadcast %c16_i32_43 : i32 to vector<8x256xi32>
    %108 = arith.cmpi slt, %102, %107 : vector<8x256xi32>
    %109 = arith.andi %106, %108 : vector<8x256xi1>
    %c0_i32_44 = arith.constant 0 : i32
    %110 = vector.broadcast %c0_i32_44 : i32 to vector<8x256xi32>
    %111 = arith.cmpi sge, %104, %110 : vector<8x256xi32>
    %112 = arith.andi %109, %111 : vector<8x256xi1>
    %c16_i32_45 = arith.constant 16 : i32
    %113 = vector.broadcast %c16_i32_45 : i32 to vector<8x256xi32>
    %114 = arith.cmpi slt, %104, %113 : vector<8x256xi32>
    %115 = arith.andi %112, %114 : vector<8x256xi1>
    %c1_i32_46 = arith.constant 1 : i32
    %116 = vector.broadcast %c1_i32_46 : i32 to vector<8x256xi32>
    %117 = arith.addi %10, %116 : vector<8x256xi32>
    %c0_i32_47 = arith.constant 0 : i32
    %118 = vector.broadcast %c0_i32_47 : i32 to vector<8x256xi32>
    %119 = arith.addi %6, %118 : vector<8x256xi32>
    %c0_i32_48 = arith.constant 0 : i32
    %120 = vector.broadcast %c0_i32_48 : i32 to vector<8x256xi32>
    %121 = arith.cmpi sge, %117, %120 : vector<8x256xi32>
    %c16_i32_49 = arith.constant 16 : i32
    %122 = vector.broadcast %c16_i32_49 : i32 to vector<8x256xi32>
    %123 = arith.cmpi slt, %117, %122 : vector<8x256xi32>
    %124 = arith.andi %121, %123 : vector<8x256xi1>
    %c0_i32_50 = arith.constant 0 : i32
    %125 = vector.broadcast %c0_i32_50 : i32 to vector<8x256xi32>
    %126 = arith.cmpi sge, %119, %125 : vector<8x256xi32>
    %127 = arith.andi %124, %126 : vector<8x256xi1>
    %c16_i32_51 = arith.constant 16 : i32
    %128 = vector.broadcast %c16_i32_51 : i32 to vector<8x256xi32>
    %129 = arith.cmpi slt, %119, %128 : vector<8x256xi32>
    %130 = arith.andi %127, %129 : vector<8x256xi1>
    %c1_i32_52 = arith.constant 1 : i32
    %131 = vector.broadcast %c1_i32_52 : i32 to vector<8x256xi32>
    %132 = arith.addi %10, %131 : vector<8x256xi32>
    %c1_i32_53 = arith.constant 1 : i32
    %133 = vector.broadcast %c1_i32_53 : i32 to vector<8x256xi32>
    %134 = arith.addi %6, %133 : vector<8x256xi32>
    %c0_i32_54 = arith.constant 0 : i32
    %135 = vector.broadcast %c0_i32_54 : i32 to vector<8x256xi32>
    %136 = arith.cmpi sge, %132, %135 : vector<8x256xi32>
    %c16_i32_55 = arith.constant 16 : i32
    %137 = vector.broadcast %c16_i32_55 : i32 to vector<8x256xi32>
    %138 = arith.cmpi slt, %132, %137 : vector<8x256xi32>
    %139 = arith.andi %136, %138 : vector<8x256xi1>
    %c0_i32_56 = arith.constant 0 : i32
    %140 = vector.broadcast %c0_i32_56 : i32 to vector<8x256xi32>
    %141 = arith.cmpi sge, %134, %140 : vector<8x256xi32>
    %142 = arith.andi %139, %141 : vector<8x256xi1>
    %c16_i32_57 = arith.constant 16 : i32
    %143 = vector.broadcast %c16_i32_57 : i32 to vector<8x256xi32>
    %144 = arith.cmpi slt, %134, %143 : vector<8x256xi32>
    %145 = arith.andi %142, %144 : vector<8x256xi1>
    %c17_i32 = arith.constant 17 : i32
    %146 = tpu.dynamic_rotate %0 by %c17_i32 dim 1 : vector<8x256xf32>, i32 -> vector<8x256xf32>
    %cst = arith.constant 0.000000e+00 : f32
    %147 = vector.broadcast %cst : f32 to vector<8x256xf32>
    %148 = arith.select %25, %146, %147 : vector<8x256xi1>, vector<8x256xf32>
    %c16_i32_58 = arith.constant 16 : i32
    %149 = tpu.dynamic_rotate %0 by %c16_i32_58 dim 1 : vector<8x256xf32>, i32 -> vector<8x256xf32>
    %cst_59 = arith.constant 0.000000e+00 : f32
    %150 = vector.broadcast %cst_59 : f32 to vector<8x256xf32>
    %151 = arith.select %40, %149, %150 : vector<8x256xi1>, vector<8x256xf32>
    %c15_i32_60 = arith.constant 15 : i32
    %152 = tpu.dynamic_rotate %0 by %c15_i32_60 dim 1 : vector<8x256xf32>, i32 -> vector<8x256xf32>
    %cst_61 = arith.constant 0.000000e+00 : f32
    %153 = vector.broadcast %cst_61 : f32 to vector<8x256xf32>
    %154 = arith.select %55, %152, %153 : vector<8x256xi1>, vector<8x256xf32>
    %c1_i32_62 = arith.constant 1 : i32
    %155 = tpu.dynamic_rotate %0 by %c1_i32_62 dim 1 : vector<8x256xf32>, i32 -> vector<8x256xf32>
    %cst_63 = arith.constant 0.000000e+00 : f32
    %156 = vector.broadcast %cst_63 : f32 to vector<8x256xf32>
    %157 = arith.select %70, %155, %156 : vector<8x256xi1>, vector<8x256xf32>
    %cst_64 = arith.constant 0.000000e+00 : f32
    %158 = vector.broadcast %cst_64 : f32 to vector<8x256xf32>
    %159 = arith.select %85, %0, %158 : vector<8x256xi1>, vector<8x256xf32>
    %c255_i32 = arith.constant 255 : i32
    %160 = tpu.dynamic_rotate %0 by %c255_i32 dim 1 : vector<8x256xf32>, i32 -> vector<8x256xf32>
    %cst_65 = arith.constant 0.000000e+00 : f32
    %161 = vector.broadcast %cst_65 : f32 to vector<8x256xf32>
    %162 = arith.select %100, %160, %161 : vector<8x256xi1>, vector<8x256xf32>
    %c241_i32 = arith.constant 241 : i32
    %163 = tpu.dynamic_rotate %0 by %c241_i32 dim 1 : vector<8x256xf32>, i32 -> vector<8x256xf32>
    %cst_66 = arith.constant 0.000000e+00 : f32
    %164 = vector.broadcast %cst_66 : f32 to vector<8x256xf32>
    %165 = arith.select %115, %163, %164 : vector<8x256xi1>, vector<8x256xf32>
    %c240_i32 = arith.constant 240 : i32
    %166 = tpu.dynamic_rotate %0 by %c240_i32 dim 1 : vector<8x256xf32>, i32 -> vector<8x256xf32>
    %cst_67 = arith.constant 0.000000e+00 : f32
    %167 = vector.broadcast %cst_67 : f32 to vector<8x256xf32>
    %168 = arith.select %130, %166, %167 : vector<8x256xi1>, vector<8x256xf32>
    %c239_i32 = arith.constant 239 : i32
    %169 = tpu.dynamic_rotate %0 by %c239_i32 dim 1 : vector<8x256xf32>, i32 -> vector<8x256xf32>
    %cst_68 = arith.constant 0.000000e+00 : f32
    %170 = vector.broadcast %cst_68 : f32 to vector<8x256xf32>
    %171 = arith.select %145, %169, %170 : vector<8x256xi1>, vector<8x256xf32>
    %172 = tpu.concatenate %148, %151, %154, %157, %159, %162, %165, %168, %171 in 0 : vector<8x256xf32>, vector<8x256xf32>, vector<8x256xf32>, vector<8x256xf32>, vector<8x256xf32>, vector<8x256xf32>, vector<8x256xf32>, vector<8x256xf32>, vector<8x256xf32> -> vector<72x256xf32>
    %cst_69 = arith.constant dense<0.000000e+00> : vector<8x256xf32>
    %173 = tpu.matmul %1, %172, %cst_69 {dimension_numbers = #tpu.dot_dimension_numbers<[1], [0], [0], [1], [0, 0, 1, 1], [], []>} : vector<8x72xf32>, vector<72x256xf32>, vector<8x256xf32> -> vector<8x256xf32>
    %174 = arith.mulf %173, %173 : vector<8x256xf32>
    %175 = tpu.concatenate %173, %174 in 0 : vector<8x256xf32>, vector<8x256xf32> -> vector<16x256xf32>
    %cst_70 = arith.constant dense<0.000000e+00> : vector<16xf32>
    %176 = vector.multi_reduction <add>, %175, %cst_70 [1] : vector<16x256xf32> to vector<16xf32>
    %177 = vector.shape_cast %176 : vector<16xf32> to vector<16x1xf32>
    %178 = vector.extract_strided_slice %177 {offsets = [0, 0], sizes = [4, 1], strides = [1, 1]} : vector<16x1xf32> to vector<4x1xf32>
    %179 = vector.extract_strided_slice %177 {offsets = [8, 0], sizes = [4, 1], strides = [1, 1]} : vector<16x1xf32> to vector<4x1xf32>
    %180 = vector.extract_strided_slice %177 {offsets = [4, 0], sizes = [4, 1], strides = [1, 1]} : vector<16x1xf32> to vector<4x1xf32>
    %181 = arith.addf %178, %180 : vector<4x1xf32>
    %182 = vector.extract_strided_slice %177 {offsets = [12, 0], sizes = [4, 1], strides = [1, 1]} : vector<16x1xf32> to vector<4x1xf32>
    %183 = arith.addf %179, %182 : vector<4x1xf32>
    %cst_71 = arith.constant 0.001953125 : f32
    %184 = vector.broadcast %cst_71 : f32 to vector<4x1xf32>
    %185 = arith.mulf %181, %184 : vector<4x1xf32>
    %cst_72 = arith.constant 0.001953125 : f32
    %186 = vector.broadcast %cst_72 : f32 to vector<4x1xf32>
    %187 = arith.mulf %183, %186 : vector<4x1xf32>
    %188 = arith.mulf %185, %185 : vector<4x1xf32>
    %189 = arith.subf %187, %188 : vector<4x1xf32>
    %cst_73 = arith.constant 0.000000e+00 : f32
    %190 = vector.broadcast %cst_73 : f32 to vector<4x1xf32>
    %191 = arith.maximumf %189, %190 : vector<4x1xf32>
    %cst_74 = arith.constant 9.99999974E-6 : f32
    %192 = vector.broadcast %cst_74 : f32 to vector<4x1xf32>
    %193 = arith.addf %191, %192 : vector<4x1xf32>
    %194 = math.rsqrt %193 : vector<4x1xf32>
    %195 = arith.mulf %2, %194 : vector<4x1xf32>
    %196 = arith.mulf %185, %195 : vector<4x1xf32>
    %197 = arith.subf %3, %196 : vector<4x1xf32>
    %198 = tpu.concatenate %195, %195 in 0 : vector<4x1xf32>, vector<4x1xf32> -> vector<8x1xf32>
    %199 = tpu.concatenate %197, %197 in 0 : vector<4x1xf32>, vector<4x1xf32> -> vector<8x1xf32>
    %200 = vector.broadcast %198 : vector<8x1xf32> to vector<8x256xf32>
    %201 = arith.mulf %173, %200 : vector<8x256xf32>
    %202 = vector.broadcast %199 : vector<8x1xf32> to vector<8x256xf32>
    %203 = arith.addf %201, %202 : vector<8x256xf32>
    %cst_75 = arith.constant 0.000000e+00 : f32
    %204 = vector.broadcast %cst_75 : f32 to vector<8x256xf32>
    %205 = arith.maximumf %203, %204 : vector<8x256xf32>
    %c17_i32_76 = arith.constant 17 : i32
    %206 = tpu.dynamic_rotate %205 by %c17_i32_76 dim 1 : vector<8x256xf32>, i32 -> vector<8x256xf32>
    %cst_77 = arith.constant 0.000000e+00 : f32
    %207 = vector.broadcast %cst_77 : f32 to vector<8x256xf32>
    %208 = arith.select %25, %206, %207 : vector<8x256xi1>, vector<8x256xf32>
    %c16_i32_78 = arith.constant 16 : i32
    %209 = tpu.dynamic_rotate %205 by %c16_i32_78 dim 1 : vector<8x256xf32>, i32 -> vector<8x256xf32>
    %cst_79 = arith.constant 0.000000e+00 : f32
    %210 = vector.broadcast %cst_79 : f32 to vector<8x256xf32>
    %211 = arith.select %40, %209, %210 : vector<8x256xi1>, vector<8x256xf32>
    %c15_i32_80 = arith.constant 15 : i32
    %212 = tpu.dynamic_rotate %205 by %c15_i32_80 dim 1 : vector<8x256xf32>, i32 -> vector<8x256xf32>
    %cst_81 = arith.constant 0.000000e+00 : f32
    %213 = vector.broadcast %cst_81 : f32 to vector<8x256xf32>
    %214 = arith.select %55, %212, %213 : vector<8x256xi1>, vector<8x256xf32>
    %c1_i32_82 = arith.constant 1 : i32
    %215 = tpu.dynamic_rotate %205 by %c1_i32_82 dim 1 : vector<8x256xf32>, i32 -> vector<8x256xf32>
    %cst_83 = arith.constant 0.000000e+00 : f32
    %216 = vector.broadcast %cst_83 : f32 to vector<8x256xf32>
    %217 = arith.select %70, %215, %216 : vector<8x256xi1>, vector<8x256xf32>
    %cst_84 = arith.constant 0.000000e+00 : f32
    %218 = vector.broadcast %cst_84 : f32 to vector<8x256xf32>
    %219 = arith.select %85, %205, %218 : vector<8x256xi1>, vector<8x256xf32>
    %c255_i32_85 = arith.constant 255 : i32
    %220 = tpu.dynamic_rotate %205 by %c255_i32_85 dim 1 : vector<8x256xf32>, i32 -> vector<8x256xf32>
    %cst_86 = arith.constant 0.000000e+00 : f32
    %221 = vector.broadcast %cst_86 : f32 to vector<8x256xf32>
    %222 = arith.select %100, %220, %221 : vector<8x256xi1>, vector<8x256xf32>
    %c241_i32_87 = arith.constant 241 : i32
    %223 = tpu.dynamic_rotate %205 by %c241_i32_87 dim 1 : vector<8x256xf32>, i32 -> vector<8x256xf32>
    %cst_88 = arith.constant 0.000000e+00 : f32
    %224 = vector.broadcast %cst_88 : f32 to vector<8x256xf32>
    %225 = arith.select %115, %223, %224 : vector<8x256xi1>, vector<8x256xf32>
    %c240_i32_89 = arith.constant 240 : i32
    %226 = tpu.dynamic_rotate %205 by %c240_i32_89 dim 1 : vector<8x256xf32>, i32 -> vector<8x256xf32>
    %cst_90 = arith.constant 0.000000e+00 : f32
    %227 = vector.broadcast %cst_90 : f32 to vector<8x256xf32>
    %228 = arith.select %130, %226, %227 : vector<8x256xi1>, vector<8x256xf32>
    %c239_i32_91 = arith.constant 239 : i32
    %229 = tpu.dynamic_rotate %205 by %c239_i32_91 dim 1 : vector<8x256xf32>, i32 -> vector<8x256xf32>
    %cst_92 = arith.constant 0.000000e+00 : f32
    %230 = vector.broadcast %cst_92 : f32 to vector<8x256xf32>
    %231 = arith.select %145, %229, %230 : vector<8x256xi1>, vector<8x256xf32>
    %232 = tpu.concatenate %208, %211, %214, %217, %219, %222, %225, %228, %231 in 0 : vector<8x256xf32>, vector<8x256xf32>, vector<8x256xf32>, vector<8x256xf32>, vector<8x256xf32>, vector<8x256xf32>, vector<8x256xf32>, vector<8x256xf32>, vector<8x256xf32> -> vector<72x256xf32>
    %cst_93 = arith.constant dense<0.000000e+00> : vector<8x256xf32>
    %233 = tpu.matmul %1, %232, %cst_93 {dimension_numbers = #tpu.dot_dimension_numbers<[1], [0], [0], [1], [0, 0, 1, 1], [], []>} : vector<8x72xf32>, vector<72x256xf32>, vector<8x256xf32> -> vector<8x256xf32>
    %234 = arith.mulf %233, %233 : vector<8x256xf32>
    %235 = tpu.concatenate %233, %234 in 0 : vector<8x256xf32>, vector<8x256xf32> -> vector<16x256xf32>
    %cst_94 = arith.constant dense<0.000000e+00> : vector<16xf32>
    %236 = vector.multi_reduction <add>, %235, %cst_94 [1] : vector<16x256xf32> to vector<16xf32>
    %237 = vector.shape_cast %236 : vector<16xf32> to vector<16x1xf32>
    %238 = vector.extract_strided_slice %237 {offsets = [0, 0], sizes = [4, 1], strides = [1, 1]} : vector<16x1xf32> to vector<4x1xf32>
    %239 = vector.extract_strided_slice %237 {offsets = [8, 0], sizes = [4, 1], strides = [1, 1]} : vector<16x1xf32> to vector<4x1xf32>
    %240 = vector.extract_strided_slice %237 {offsets = [4, 0], sizes = [4, 1], strides = [1, 1]} : vector<16x1xf32> to vector<4x1xf32>
    %241 = arith.addf %238, %240 : vector<4x1xf32>
    %242 = vector.extract_strided_slice %237 {offsets = [12, 0], sizes = [4, 1], strides = [1, 1]} : vector<16x1xf32> to vector<4x1xf32>
    %243 = arith.addf %239, %242 : vector<4x1xf32>
    %cst_95 = arith.constant 0.001953125 : f32
    %244 = vector.broadcast %cst_95 : f32 to vector<4x1xf32>
    %245 = arith.mulf %241, %244 : vector<4x1xf32>
    %cst_96 = arith.constant 0.001953125 : f32
    %246 = vector.broadcast %cst_96 : f32 to vector<4x1xf32>
    %247 = arith.mulf %243, %246 : vector<4x1xf32>
    %248 = arith.mulf %245, %245 : vector<4x1xf32>
    %249 = arith.subf %247, %248 : vector<4x1xf32>
    %cst_97 = arith.constant 0.000000e+00 : f32
    %250 = vector.broadcast %cst_97 : f32 to vector<4x1xf32>
    %251 = arith.maximumf %249, %250 : vector<4x1xf32>
    %cst_98 = arith.constant 9.99999974E-6 : f32
    %252 = vector.broadcast %cst_98 : f32 to vector<4x1xf32>
    %253 = arith.addf %251, %252 : vector<4x1xf32>
    %254 = math.rsqrt %253 : vector<4x1xf32>
    %255 = arith.mulf %2, %254 : vector<4x1xf32>
    %256 = arith.mulf %245, %255 : vector<4x1xf32>
    %257 = arith.subf %3, %256 : vector<4x1xf32>
    %258 = tpu.concatenate %255, %255 in 0 : vector<4x1xf32>, vector<4x1xf32> -> vector<8x1xf32>
    %259 = tpu.concatenate %257, %257 in 0 : vector<4x1xf32>, vector<4x1xf32> -> vector<8x1xf32>
    %260 = vector.broadcast %258 : vector<8x1xf32> to vector<8x256xf32>
    %261 = arith.mulf %233, %260 : vector<8x256xf32>
    %262 = vector.broadcast %259 : vector<8x1xf32> to vector<8x256xf32>
    %263 = arith.addf %261, %262 : vector<8x256xf32>
    %cst_99 = arith.constant 0.000000e+00 : f32
    %264 = vector.broadcast %cst_99 : f32 to vector<8x256xf32>
    %265 = arith.maximumf %263, %264 : vector<8x256xf32>
    %266 = arith.addf %265, %0 : vector<8x256xf32>
    %c0_100 = arith.constant 0 : index
    %c0_101 = arith.constant 0 : index
    %267 = vector.load %arg4[%c0_100, %c0_101] : memref<8x256xf32, #tpu.memory_space<vmem>>, vector<8x256xf32>
    tpu.vector_store %arg4[%c0_100, %c0_101], %266 {strides = array<i32>} : memref<8x256xf32, #tpu.memory_space<vmem>>, vector<8x256xf32>,
    return
  }
}

</mosaic_0001>

<bundles_post_ra>
// kernel: tpu_custom_call.1
= control target key start
LH: loop header
LB: loop body
LE: loop exit
PB: predicated region body
PF: predicated region fallthrough
CT: control target
= control target key end

     0   :  { %9 = vsyncpa [#allocation3], 0  ;;  %s1195_s0 = inlined_call_operand.hbm [shape: f32[8,256], index: 0, kind: input, shape index: {}]   ;;  %s1196_s1 = inlined_call_operand.vmem [shape: f32[8,72], index: 1, kind: input, shape index: {}]   ;;  %s1197_s2 = inlined_call_operand.vmem [shape: f32[4,1], index: 2, kind: input, shape index: {}]   ;;  %s1198_s3 = inlined_call_operand.vmem [shape: f32[4,1], index: 3, kind: input, shape index: {}]   ;;  %s1199_s4 = inlined_call_operand.hbm [shape: f32[8,256], index: 4, kind: output, shape index: {}]  }
   0x1   :  { %10 = vsyncpa [#allocation4], 0  ;;  %s746_s15 = smov [#allocation2]   ;;  %s698_s19 = scalar_lea.hbm %s1195_s0, 256 }
   0x2   :  { %s17_s16 = sshll.u32 %s746_s15, 4  ;;  %p699_p0 = scmp.ne.s32.totalorder %s1195_s0, %s698_s19  ;;  %s18_s16 = int_to_ptr.vmem [resolvable:$true] %s17_s16 }
   0x3   :  { %p702_p1 = scmp.lt.u32.totalorder %s698_s19, %s1195_s0 }
   0x5   :  { %p704_p2 = pnand %p702_p1, %p699_p0 }
   0x7   :  { %707 = shalt.err (!%p704_p2)
}
   0x8   :  { %s708_s24 = scalar_lea.vmem %s18_s16, 256  ;;  %p713_p4 = scmp.lt.s32.totalorder %s18_s16, %s18_s16 }
   0x9   :  { %p709_p3 = scmp.ne.s32.totalorder %s18_s16, %s708_s24  ;;  %p714_p5 = scmp.lt.s32.totalorder %s708_s24, %s708_s24 }
   0xb   :  { %p715_p6 = por %p714_p5, %p713_p4 }
   0xd   :  { %p716_p7 = pnand %p715_p6, %p709_p3 }
   0xf   :  { %719 = shalt.err (!%p716_p7)
}
  0x10   :  { %20 = dma.hbm_to_vmem [thread:$0]  %s1195_s0, 256, %s18_s16, [#allocation3]  }
  0x11   :  { %742 = dma.done.wait [#allocation3], 256  }
  0x12   :  { %743 = vsyncadd [#allocation3], 4294967040  ;;  %v795_v0 = vld [vmem:[#allocation2] sm:$0xff]  ;;  %v797_v1 = vld [vmem:[#allocation2 + $0x8] sm:$0xff]  ;;  %s747_s27 = smov 15   ;;  %s748_s28 = smov 17   ;;  %v35_v4 = vlaneseq }
  0x13   :  { %v632_v2 = vpack.i.bf16 %v797_v1, %v795_v0  ;;  %s749_s29 = smov 1   ;;  %s750_s30 = smov 16   ;;  %v755_v3 = vmov 0.0   ;;  %v1228_v20 = vmov 0  ;;  %v1230_v22 = vmov 0 }
  0x14   :  { %s751_s0 = smov 127   ;;  %s752_s5 = smov 113   ;;  %260 = vmatprep.mubr.f32.mxu0 %v755_v3  ;;  %448 = vmatprep.mubr.f32.mxu1 %v755_v3  ;;  %v812_v5 = vand.u32 127, %v35_v4  ;;  %v1232_v23 = vmov 0  ;;  %v1234_v31 = vmov 0  ;;  %v1236_v32 = vmov 0 }
  0x15   :  { %633 = vrot.lane.b32.xlu1 %v632_v2, %s747_s27  ;;  %623 = vrot.lane.b32.xlu0 %v632_v2, %s748_s28  ;;  %s753_s6 = smov 112   ;;  %s754_s7 = smov 111   ;;  %v1238_v35 = vmov 0  ;;  %v1240_v41 = vmov 0 }
  0x16   :  { %v37_v6 = vadd.s32 128, %v812_v5  ;;  %v40_v8 = vshra.s32 %v812_v5, 4  ;;  %v38_v13 = vand.u32 15, %v812_v5 }
  0x18   :  { %v41_v7 = vshra.s32 %v37_v6, 4  ;;  %v42_v10 = vand.u32 15, %v40_v8  ;;  %v39_v11 = vand.u32 15, %v37_v6  ;;  %v819_v16 = vadd.s32 4294967295, %v38_v13 }
  0x19   :  { %638 = vrot.lane.b32.xlu1 %v632_v2, %s749_s29  ;;  %628 = vrot.lane.b32.xlu0 %v632_v2, %s750_s30  ;;  %v841_v21 = vadd.s32 1, %v38_v13 }
  0x1a   :  { %v43_v9 = vand.u32 15, %v41_v7  ;;  %v44_v14 = vadd.s32 4294967295, %v42_v10  ;;  %v817_v15 = vadd.s32 4294967295, %v39_v11  ;;  %vm1200_vm7 = vcmp.ge.s32.totalorder %v819_v16, 0 }
  0x1b   :  { %v831_v19 = vadd.s32 1, %v39_v11  ;;  %vm80_vm15 = vcmp.ge.s32.totalorder %v42_v10, 0  ;;  %v98_v36 = vadd.s32 1, %v42_v10 }
  0x1c   :  { %v45_v12 = vadd.s32 4294967295, %v43_v9  ;;  %vm48_vm2 = vcmp.ge.s32.totalorder %v44_v14, 0  ;;  %vm50_vm3 = vcmp.lt.s32.totalorder %v44_v14, 16  ;;  %vm1202_vm5 = vcmp.ge.s32.totalorder %v817_v15, 0 }
  0x1d   :  { %643 = vrot.lane.b32.xlu0 %v632_v2, %s751_s0  ;;  %648 = vrot.lane.b32.xlu1 %v632_v2, %s752_s5  ;;  %vm826_vm6 = vmand %vm48_vm2, %vm50_vm3  ;;  %vm81_vm8 = vcmp.ge.s32.totalorder %v43_v9, 0  ;;  %vm83_vm9 = vcmp.lt.s32.totalorder %v43_v9, 16  ;;  %vm1201_vm12 = vcmp.lt.s32.totalorder %v831_v19, 16  ;;  %vm1203_vm2 = vcmp.lt.s32.totalorder %v841_v21, 16 }
  0x1e   :  { %vm49_vm0 = vcmp.ge.s32.totalorder %v45_v12, 0  ;;  %vm51_vm1 = vcmp.lt.s32.totalorder %v45_v12, 16  ;;  %vm847_vm11 = vmand %vm826_vm6, %vm1200_vm7  ;;  %v99_v26 = vadd.s32 1, %v43_v9  ;;  %vm100_vm7 = vcmp.ge.s32.totalorder %v98_v36, 0 }
  0x1f   :  { %vm821_vm4 = vmand %vm49_vm0, %vm51_vm1  ;;  %v1231_v22 = vsel %vm847_vm11, 4294967295, %v1230_v22  ;;  %vm82_vm0 = vcmp.lt.s32.totalorder %v42_v10, 16  ;;  %vm1246_vm11 = vcmp.lt.s32.totalorder %v812_v5, 16 }
  0x20   :  { %vm837_vm10 = vmand %vm821_vm4, %vm1202_vm5  ;;  %vm103_vm14 = vcmp.lt.s32.totalorder %v99_v26, 16 }
  0x21   :  { %653 = vrot.lane.b32.xlu0 %v632_v2, %s753_s6  ;;  %183 = vrot.lane.b32.xlu1 %v795_v0, %s754_s7  ;;  %v1229_v20 = vsel %vm837_vm10, 4294967295, %v1228_v20  ;;  %vm852_vm13 = vmand %vm81_vm8, %vm83_vm9  ;;  %vm1206_vm8 = vcmp.lt.s32.totalorder %v812_v5, 15  ;;  %vm1207_vm9 = vcmp.lt.s32.totalorder %v812_v5, 17 }
  0x22   :  { %v1233_v23 = vsel %vm852_vm13, 4294967295, %v1232_v23  ;;  %vm869_vm3 = vmand %vm821_vm4, %vm1201_vm12 }
  0x23   :  { %v1235_v31 = vsel %vm869_vm3, 4294967295, %v1234_v31  ;;  %vm875_vm1 = vmand %vm80_vm15, %vm82_vm0  ;;  %vm1242_vm0 = vcmp.ge.s32.totalorder %v819_v16, 0 }
  0x24   :  { %v1237_v32 = vsel %vm875_vm1, 4294967295, %v1236_v32  ;;  %vm885_vm12 = vmand %vm852_vm13, %vm1202_vm5 }
  0x25   :  { %185 = vrot.lane.b32.xlu0 %v797_v1, %s754_s7  ;;  %v1239_v35 = vsel %vm885_vm12, 4294967295, %v1238_v35  ;;  %vm893_vm15 = vmand %vm826_vm6, %vm1203_vm2  ;;  %vm1245_vm2 = vcmp.lt.s32.totalorder %v812_v5, 1 }
  0x26   :  { %v1241_v41 = vsel %vm893_vm15, 4294967295, %v1240_v41  ;;  %vm905_vm5 = vmand %vm875_vm1, %vm1242_vm0  ;;  %vm1252_vm0 = vcmp.lt.s32.totalorder %v812_v5, 1  ;;  %vm1254_vm1 = vcmp.ge.s32.totalorder %v99_v26, 0  ;;  %vm1259_vm15 = vcmp.lt.s32.totalorder %v812_v5, 127 }
  0x87   :  { %v634_v24 = vpop.permute.xlu1 %633  ;;  %v624_v25 = vpop.permute.xlu0 %623 }
  0x88   :  { %v636_v27 = vunpack.i.h.bf16 %v634_v24  ;;  %v635_v28 = vunpack.i.l.bf16 %v634_v24  ;;  %v626_v29 = vunpack.i.h.bf16 %v624_v25  ;;  %v625_v30 = vunpack.i.l.bf16 %v624_v25 }
  0x8a   :  { %v141_v42 = vsel %vm1206_vm8, %v635_v28, %v636_v27  ;;  %v123_v43 = vsel %vm1207_vm9, %v625_v30, %v626_v29  ;;  %v124_v47 = vsel %vm1207_vm9, %v626_v29, %v625_v30  ;;  %vm1247_vm8 = vmmov %vm1246_vm11  ;;  %vm1251_vm9 = vcmp.lt.s32.totalorder %v812_v5, 15 }
  0x8b   :  { %v639_v33 = vpop.permute.xlu1 %638  ;;  %v629_v34 = vpop.permute.xlu0 %628  ;;  %v142_v58 = vsel %vm1251_vm9, %v636_v27, %v635_v28  ;;  %vm1257_vm9 = vnez %v1231_v22  ;;  %v1283_v29 = vmov 0 }
  0x8c   :  { %v641_v37 = vunpack.i.h.bf16 %v639_v33  ;;  %v640_v38 = vunpack.i.l.bf16 %v639_v33  ;;  %v631_v39 = vunpack.i.h.bf16 %v629_v34  ;;  %v630_v40 = vunpack.i.l.bf16 %v629_v34  ;;  %v1070_v33 = vld [vmem:[%s1196_s1] sm:$0xff] }
  0x8e   :  { %v150_v45 = vsel %vm1245_vm2, %v640_v38, %v641_v37  ;;  %v132_v46 = vsel %vm1246_vm11, %v630_v40, %v631_v39  ;;  %v133_v48 = vsel %vm1247_vm8, %v631_v39, %v630_v40  ;;  %vm1248_vm2 = vcmp.lt.s32.totalorder %v831_v19, 16  ;;  %vm946_vm8 = vmand %vm1254_vm1, %vm103_vm14 }
  0x8f   :  { %v562_v49 = vpack.c.bf16 %v132_v46, %v123_v43  ;;  %v565_v50 = vpack.c.bf16 %v133_v48, %v124_v47  ;;  %v644_v51 = vpop.permute.xlu0 %643  ;;  %v649_v52 = vpop.permute.xlu1 %648  ;;  %vm926_vm11 = vmand %vm852_vm13, %vm1248_vm2  ;;  %v151_v59 = vsel %vm1252_vm0, %v641_v37, %v640_v38  ;;  %v568_v60 = vpack.c.bf16 %v150_v45, %v141_v42 }
  0x90   :  { %v646_v54 = vunpack.i.h.bf16 %v644_v51  ;;  %v645_v55 = vunpack.i.l.bf16 %v644_v51  ;;  %v651_v56 = vunpack.i.h.bf16 %v649_v52  ;;  %v650_v57 = vunpack.i.l.bf16 %v649_v52  ;;  %vm1253_vm2 = vmpackc.low %vm821_vm4, %vm837_vm10 }
  0x91   :  { %564 = vmatprep.subr.msk.bf16.mxu0 %vm1253_vm2, %v562_v49  ;;  %vm1258_vm0 = vmpackc.low %vm826_vm6, %vm1257_vm9  ;;  %vm102_vm10 = vcmp.lt.s32.totalorder %v98_v36, 16  ;;  %vm1263_vm2 = vnez %v1237_v32  ;;  %v571_v6 = vpack.c.bf16 %v151_v59, %v142_v58  ;;  %v756_v40 = vmov 0   ;;  %v1085_v59 = vld [vmem:[%s1198_s3] sm:$0xf] }
  0x92   :  { %567 = vmatpush1.bf16.msk.msra.mxu0 %vm1258_vm0, %v565_v50  ;;  %v162_v62 = vsel %vm1259_vm15, %v646_v54, %v645_v55  ;;  %vm1260_vm14 = vmmov %vm1259_vm15  ;;  %vm1262_vm0 = vcmp.lt.s32.totalorder %v841_v21, 16  ;;  %657 = vset.pattern.permute.xlu0 %v756_v40 }
  0x93   :  { %v161_v63 = vsel %vm1260_vm14, %v645_v55, %v646_v54  ;;  %v574_v2 = vpack.c.bf16 %v162_v62, %v797_v1  ;;  %vm1261_vm1 = vmpackc.low %vm885_vm12, %vm869_vm3  ;;  %v654_v3 = vpop.permute.xlu0 %653  ;;  %vm1266_vm14 = vcmp.lt.s32.totalorder %v812_v5, 113  ;;  %vm1267_vm3 = vcmp.ge.s32.totalorder %v817_v15, 0  ;;  %v184_v26 = vpop.permute.xlu1 %183  ;;  %658 = vset.pattern.permute.xlu1 %v756_v40 }
  0x94   :  { %570 = vmatprep.subr.msk.bf16.mxu0 %vm1261_vm1, %v568_v60  ;;  %vm974_vm9 = vmand %vm1263_vm2, %vm1262_vm0  ;;  %v171_v7 = vsel %vm1266_vm14, %v651_v56, %v650_v57  ;;  %v656_v8 = vunpack.i.h.bf16 %v654_v3  ;;  %v655_v9 = vunpack.i.l.bf16 %v654_v3  ;;  %v577_v12 = vpack.c.bf16 %v161_v63, %v795_v0 }
  0x95   :  { %vm984_vm1 = vmand %vm946_vm8, %vm1267_vm3  ;;  %vm1272_vm0 = vnez %v1241_v41  ;;  %vm1274_vm12 = vcmp.lt.s32.totalorder %v812_v5, 112  ;;  %vm1278_vm3 = vcmp.ge.s32.totalorder %v819_v16, 0 }
  0x96   :  { %vm988_vm15 = vmand %vm100_vm7, %vm102_vm10  ;;  %v180_v13 = vsel %vm1274_vm12, %v656_v8, %v655_v9  ;;  %vm1275_vm7 = vcmp.lt.s32.totalorder %v812_v5, 113 }
  0x97   :  { %vm1273_vm14 = vmpackc.low %vm905_vm5, %vm1272_vm0  ;;  %v170_v14 = vsel %vm1275_vm7, %v650_v57, %v651_v56  ;;  %v580_v24 = vpack.c.bf16 %v180_v13, %v171_v7  ;;  %v186_v27 = vpop.permute.xlu0 %185  ;;  %v1079_v56 = vld [vmem:[%s1197_s2] sm:$0xf]  ;;  %s757_s2 = smov [#allocation5]  }
  0x98   :  { %573 = vmatpush1.bf16.msk.msra.mxu0 %vm1273_vm14, %v571_v6  ;;  %vm1276_vm10 = vmmov %vm1274_vm12  ;;  %s515_s3 = sshll.u32 %s757_s2, 4  ;;  %s516_s3 = int_to_ptr.vmem [resolvable:$true] %s515_s3 }
  0x99   :  { %v179_v15 = vsel %vm1276_vm10, %v655_v9, %v656_v8  ;;  %vm1277_vm14 = vmpackc.low %vm926_vm11, %vm852_vm13  ;;  %vm1220_vm10 = vcmp.lt.s32.totalorder %v812_v5, 111  ;;  %vm1282_vm13 = vcmp.lt.s32.totalorder %v831_v19, 16  ;;  %v1286_v19 = vmov 0  ;;  %s720_s13 = scalar_lea.vmem %s516_s3, 256  ;;  %p725_p9 = scmp.lt.s32.totalorder %s516_s3, %s516_s3 }
  0x9a   :  { %576 = vmatprep.subr.msk.bf16.mxu0 %vm1277_vm14, %v574_v2  ;;  %vm1221_vm12 = vmpackc.low %vm946_vm8, %vm984_vm1  ;;  %v583_v28 = vpack.c.bf16 %v179_v15, %v170_v14  ;;  %v189_v16 = vsel %vm1220_vm10, %v186_v27, %v184_v26  ;;  %v188_v30 = vsel %vm1220_vm10, %v184_v26, %v186_v27  ;;  %p721_p8 = scmp.ne.s32.totalorder %s516_s3, %s720_s13  ;;  %p726_p10 = scmp.lt.s32.totalorder %s720_s13, %s720_s13 }
  0x9b   :  { %vm1021_vm7 = vmand %vm988_vm15, %vm1278_vm3 }
  0x9c   :  { %vm1281_vm14 = vmpackc.low %vm974_vm9, %vm1263_vm2  ;;  %p727_p11 = por %p726_p10, %p725_p9 }
  0x9d   :  { %579 = vmatpush1.bf16.msk.msra.mxu0 %vm1281_vm14, %v577_v12  ;;  %vm1217_vm3 = vmpackc.low %vm988_vm15, %vm1021_vm7  ;;  %vm1285_vm14 = vcmp.lt.s32.totalorder %v841_v21, 16 }
  0x9e   :  { %582 = vmatprep.subr.msk.bf16.mxu0 %vm1221_vm12, %v580_v24  ;;  %vm1046_vm2 = vmand %vm946_vm8, %vm1282_vm13  ;;  %p728_p12 = pnand %p727_p11, %p721_p8 }
  0x9f   :  { %v1284_v29 = vsel %vm1046_vm2, 4294967295, %v1283_v29  ;;  %vm1063_vm13 = vmand %vm988_vm15, %vm1285_vm14  ;;  %vm1218_vm14 = vcmask 1043456  }
  0xa0   :  { %v1287_v19 = vsel %vm1063_vm13, 4294967295, %v1286_v19 }
  0xa1   :  { %585 = vmatpush1.bf16.msk.msra.mxu0 %vm1217_vm3, %v583_v28  ;;  %vm1219_vm3 = vcmask 588800  }
  0xa2   :  { %540 = vmatprep.subr.msk.mxu0 %vm1046_vm2, %v189_v16 }
  0xa5   :  { %541 = vmatpush1.msk.msra.mxu0 %vm1063_vm13, %v188_v30  ;;  %vm1292_vm13 = vnez %v1229_v20 }
  0xa6   :  { %542 = vmatmul.mubr.msk.f32.vlgmr.msra.gmra.mrb[0].mxu0 %vm1219_vm3, %v1070_v33  ;;  %vm1289_vm3 = vcmp.lt.s32.totalorder %v812_v5, 16  ;;  %vm1293_vm2 = vmpackc.low %vm821_vm4, %vm1292_vm13  ;;  %vm1298_vm4 = vcmp.lt.s32.totalorder %v812_v5, 1  ;;  %vm1301_vm13 = vnez %v1235_v31 }
  0xa7   :  { %vm1291_vm12 = vmmov %vm1289_vm3 }
 0x179   :  { %v262_v34 = vpop.f32.mrb[0].mxu0 }
 0x17a   :  { %v264_v21 = vpop.f32.mrb[1].mxu0  ;;  %v267_v36 = vmul.f32 %v262_v34, %v262_v34 }
 0x17b   :  { %v268_v37 = vmul.f32 %v264_v21, %v264_v21  ;;  %v269_v38 = vadd.f32 %v264_v21, %v262_v34 }
 0x17d   :  { %270 = vadd.xlane.f32.xlu1 %v269_v38  ;;  %v272_v39 = vadd.f32 %v268_v37, %v267_v36 }
 0x17f   :  { %273 = vadd.xlane.f32.xlu0 %v272_v39 }
 0x20a   :  { %v271_v42 = vpop.xlane.xlu1 %270 }
 0x20b   :  { %v276_v43 = vrot.slane %v271_v42, 4 }
 0x20c   :  { %v274_v45 = vpop.xlane.xlu0 %273 }
 0x20d   :  { %v278_v46 = vadd.f32 %v276_v43, %v271_v42  ;;  %v280_v47 = vrot.slane %v274_v45, 4 }
 0x20f   :  { %v283_v48 = vmul.f32 0.001953125, %v278_v46  ;;  %v282_v49 = vadd.f32 %v280_v47, %v274_v45 }
 0x211   :  { %v285_v50 = vmul.f32 %v283_v48, %v283_v48  ;;  %v284_v51 = vmul.f32 0.001953125, %v282_v49 }
 0x213   :  { %v286_v52 = vsub.f32 %v284_v51, %v285_v50 }
 0x215   :  { %v287_v54 = vmax.f32 %v286_v52, 0.0 }
 0x217   :  { %v288_v55 = vadd.f32 1e-05, %v287_v54 }
 0x219   :  { %694 = vrsqrt.f32 %v288_v55 }
 0x223   :  { %v695_v57 = vpop.eup %694 }
 0x224   :  { %v290_v58 = vmul.f32 %v695_v57, %v1079_v56 }
 0x226   :  { %v294_v60 = vrot.slane %v290_v58, 4  ;;  %v291_v62 = vmul.f32 %v290_v58, %v283_v48 }
 0x228   :  { %v297_v63 = vsel %vm1218_vm14, %v290_v58, %v294_v60  ;;  %v292_v2 = vsub.f32 %v1085_v59, %v291_v62 }
 0x229   :  { %304 = vperm.xlu0 %657, %v297_v63  }
 0x22a   :  { %v299_v3 = vrot.slane %v292_v2, 4 }
 0x22c   :  { %v301_v6 = vsel %vm1218_vm14, %v292_v2, %v299_v3  ;;  %vm1288_vm14 = vcmp.lt.s32.totalorder %v812_v5, 17 }
 0x22d   :  { %311 = vperm.xlu1 %658, %v301_v6   ;;  %vm1290_vm10 = vmmov %vm1288_vm14 }
 0x2a8   :  { %v305_v7 = vpop.permute.xlu0 %304 }
 0x2a9   :  { %v307_v8 = vmul.f32 %v305_v7, %v262_v34  ;;  %v308_v9 = vmul.f32 %v305_v7, %v264_v21 }
 0x2ac   :  { %v312_v12 = vpop.permute.xlu1 %311 }
 0x2ad   :  { %v314_v13 = vadd.f32 %v312_v12, %v307_v8  ;;  %v315_v14 = vadd.f32 %v312_v12, %v308_v9 }
 0x2af   :  { %v316_v15 = vmax.f32 %v314_v13, 0.0  ;;  %v317_v24 = vmax.f32 %v315_v14, 0.0 }
 0x2b1   :  { %376 = vrot.lane.b32.xlu0 %v316_v15, %s754_s7  ;;  %v659_v26 = vpack.i.bf16 %v317_v24, %v316_v15 }
 0x2b3   :  { %660 = vrot.lane.b32.xlu1 %v659_v26, %s748_s28 }
 0x2b7   :  { %665 = vrot.lane.b32.xlu1 %v659_v26, %s750_s30 }
 0x2bb   :  { %670 = vrot.lane.b32.xlu1 %v659_v26, %s747_s27 }
 0x2bf   :  { %675 = vrot.lane.b32.xlu1 %v659_v26, %s749_s29 }
 0x2c3   :  { %680 = vrot.lane.b32.xlu1 %v659_v26, %s751_s0 }
 0x2c7   :  { %685 = vrot.lane.b32.xlu1 %v659_v26, %s752_s5 }
 0x2cb   :  { %690 = vrot.lane.b32.xlu1 %v659_v26, %s753_s6 }
 0x2cf   :  { %378 = vrot.lane.b32.xlu1 %v317_v24, %s754_s7 }
 0x323   :  { %v377_v8 = vpop.permute.xlu0 %376 }
 0x325   :  { %v661_v27 = vpop.permute.xlu1 %660 }
 0x326   :  { %v663_v28 = vunpack.i.h.bf16 %v661_v27  ;;  %v662_v16 = vunpack.i.l.bf16 %v661_v27 }
 0x328   :  { %v322_v36 = vsel %vm1288_vm14, %v662_v16, %v663_v28  ;;  %v323_v38 = vsel %vm1290_vm10, %v663_v28, %v662_v16 }
 0x329   :  { %v666_v30 = vpop.permute.xlu1 %665 }
 0x32a   :  { %v668_v34 = vunpack.i.h.bf16 %v666_v30  ;;  %v667_v21 = vunpack.i.l.bf16 %v666_v30 }
 0x32c   :  { %v330_v37 = vsel %vm1289_vm3, %v667_v21, %v668_v34  ;;  %v331_v39 = vsel %vm1291_vm12, %v668_v34, %v667_v21  ;;  %vm1294_vm3 = vnez %v1231_v22  ;;  %vm1296_vm12 = vcmp.lt.s32.totalorder %v812_v5, 15 }
 0x32d   :  { %v671_v40 = vpop.permute.xlu1 %670  ;;  %v586_v42 = vpack.c.bf16 %v330_v37, %v322_v36  ;;  %v589_v43 = vpack.c.bf16 %v331_v39, %v323_v38  ;;  %vm1295_vm14 = vmpackc.low %vm826_vm6, %vm1294_vm3  ;;  %vm1300_vm6 = vnez %v1239_v35 }
 0x32e   :  { %v673_v45 = vunpack.i.h.bf16 %v671_v40  ;;  %v672_v46 = vunpack.i.l.bf16 %v671_v40  ;;  %vm1297_vm10 = vmmov %vm1296_vm12 }
 0x32f   :  { %588 = vmatprep.subr.msk.bf16.mxu1 %vm1293_vm2, %v586_v42  ;;  %vm1299_vm2 = vmmov %vm1298_vm4 }
 0x330   :  { %591 = vmatpush1.bf16.msk.msra.mxu1 %vm1295_vm14, %v589_v43  ;;  %v338_v50 = vsel %vm1296_vm12, %v672_v46, %v673_v45  ;;  %v339_v17 = vsel %vm1297_vm10, %v673_v45, %v672_v46  ;;  %vm1302_vm3 = vmpackc.low %vm1300_vm6, %vm1301_vm13  ;;  %vm1303_vm14 = vcmp.lt.s32.totalorder %v812_v5, 127  ;;  %vm1308_vm6 = vnez %v1237_v32 }
 0x331   :  { %v676_v47 = vpop.permute.xlu1 %675  ;;  %vm1304_vm12 = vmmov %vm1303_vm14 }
 0x332   :  { %v678_v48 = vunpack.i.h.bf16 %v676_v47  ;;  %v677_v49 = vunpack.i.l.bf16 %v676_v47  ;;  %vm1305_vm10 = vmpackc.low %vm905_vm5, %vm1272_vm0  ;;  %vm1310_vm5 = vcmp.lt.s32.totalorder %v812_v5, 113 }
 0x333   :  { %vm1309_vm13 = vmpackc.low %vm974_vm9, %vm1308_vm6 }
 0x334   :  { %v346_v20 = vsel %vm1298_vm4, %v677_v49, %v678_v48  ;;  %v347_v51 = vsel %vm1299_vm2, %v678_v48, %v677_v49  ;;  %vm1306_vm4 = vnez %v1233_v23  ;;  %vm1311_vm0 = vmmov %vm1310_vm5 }
 0x335   :  { %v592_v18 = vpack.c.bf16 %v346_v20, %v338_v50  ;;  %v595_v52 = vpack.c.bf16 %v347_v51, %v339_v17  ;;  %v681_v22 = vpop.permute.xlu1 %680  ;;  %vm1307_vm2 = vmpackc.low %vm926_vm11, %vm1306_vm4  ;;  %vm1312_vm11 = vcmp.lt.s32.totalorder %v812_v5, 112 }
 0x336   :  { %v683_v54 = vunpack.i.h.bf16 %v681_v22  ;;  %v682_v55 = vunpack.i.l.bf16 %v681_v22  ;;  %vm1314_vm9 = vmpackc.low %vm946_vm8, %vm984_vm1  ;;  %vm1320_vm8 = vcmask 588800  }
 0x337   :  { %594 = vmatprep.subr.msk.bf16.mxu1 %vm1302_vm3, %v592_v18  ;;  %vm1313_vm3 = vmmov %vm1312_vm11 }
 0x338   :  { %v356_v57 = vsel %vm1303_vm14, %v682_v55, %v683_v54  ;;  %v357_v58 = vsel %vm1304_vm12, %v683_v54, %v682_v55  ;;  %597 = vmatpush1.bf16.msk.msra.mxu1 %vm1305_vm10, %v595_v52  ;;  %vm1315_vm14 = vcmp.lt.s32.totalorder %v812_v5, 111  ;;  %vm1316_vm12 = vmpackc.low %vm988_vm15, %vm1021_vm7  ;;  %vm1317_vm10 = vnez %v1284_v29 }
 0x339   :  { %v598_v60 = vpack.c.bf16 %v357_v58, %v317_v24  ;;  %v601_v62 = vpack.c.bf16 %v356_v57, %v316_v15  ;;  %v686_v63 = vpop.permute.xlu1 %685  ;;  %vm1318_vm4 = vmmov %vm1315_vm14  ;;  %vm1321_vm15 = vcmask 1043456  }
 0x33a   :  { %v688_v31 = vunpack.i.h.bf16 %v686_v63  ;;  %v687_v35 = vunpack.i.l.bf16 %v686_v63  ;;  %vm1322_vm1 = vmmov %vm1321_vm15 }
 0x33b   :  { %600 = vmatprep.subr.msk.bf16.mxu1 %vm1307_vm2, %v598_v60  ;;  %vm1319_vm2 = vnez %v1287_v19 }
 0x33c   :  { %603 = vmatpush1.bf16.msk.msra.mxu1 %vm1309_vm13, %v601_v62  ;;  %v364_v3 = vsel %vm1310_vm5, %v687_v35, %v688_v31  ;;  %v365_v53 = vsel %vm1311_vm0, %v688_v31, %v687_v35 }
 0x33d   :  { %v691_v41 = vpop.permute.xlu1 %690 }
 0x33e   :  { %v693_v44 = vunpack.i.h.bf16 %v691_v41  ;;  %v692_v2 = vunpack.i.l.bf16 %v691_v41 }
 0x340   :  { %v372_v23 = vsel %vm1312_vm11, %v692_v2, %v693_v44  ;;  %v373_v6 = vsel %vm1313_vm3, %v693_v44, %v692_v2 }
 0x341   :  { %v604_v4 = vpack.c.bf16 %v373_v6, %v365_v53  ;;  %v607_v7 = vpack.c.bf16 %v372_v23, %v364_v3  ;;  %v379_v32 = vpop.permute.xlu1 %378 }
 0x342   :  { %v381_v9 = vsel %vm1315_vm14, %v379_v32, %v377_v8  ;;  %v380_v12 = vsel %vm1318_vm4, %v377_v8, %v379_v32 }
 0x343   :  { %606 = vmatprep.subr.msk.bf16.mxu1 %vm1314_vm9, %v604_v4 }
 0x344   :  { %609 = vmatpush1.bf16.msk.msra.mxu1 %vm1316_vm12, %v607_v7 }
 0x345   :  { %559 = vmatprep.subr.msk.mxu1 %vm1317_vm10, %v381_v9 }
 0x348   :  { %560 = vmatpush1.msk.msra.mxu1 %vm1319_vm2, %v380_v12 }
 0x349   :  { %561 = vmatmul.mubr.msk.f32.vlgmr.msra.gmra.mrb[0].mxu1 %vm1320_vm8, %v1070_v33 }
 0x41c   :  { %v450_v61 = vpop.f32.mrb[0].mxu1 }
 0x41d   :  { %v452_v10 = vpop.f32.mrb[1].mxu1  ;;  %v455_v13 = vmul.f32 %v450_v61, %v450_v61 }
 0x41e   :  { %v456_v11 = vmul.f32 %v452_v10, %v452_v10  ;;  %v457_v14 = vadd.f32 %v452_v10, %v450_v61 }
 0x420   :  { %458 = vadd.xlane.f32.xlu0 %v457_v14  ;;  %v460_v25 = vadd.f32 %v456_v11, %v455_v13 }
 0x422   :  { %461 = vadd.xlane.f32.xlu1 %v460_v25 }
 0x4ad   :  { %v459_v15 = vpop.xlane.xlu0 %458 }
 0x4ae   :  { %v464_v29 = vrot.slane %v459_v15, 4 }
 0x4af   :  { %v462_v24 = vpop.xlane.xlu1 %461 }
 0x4b0   :  { %v466_v26 = vadd.f32 %v464_v29, %v459_v15  ;;  %v468_v5 = vrot.slane %v462_v24, 4 }
 0x4b2   :  { %v471_v27 = vmul.f32 0.001953125, %v466_v26  ;;  %v470_v28 = vadd.f32 %v468_v5, %v462_v24 }
 0x4b4   :  { %v473_v19 = vmul.f32 %v471_v27, %v471_v27  ;;  %v472_v16 = vmul.f32 0.001953125, %v470_v28 }
 0x4b6   :  { %v474_v30 = vsub.f32 %v472_v16, %v473_v19 }
 0x4b8   :  { %v475_v34 = vmax.f32 %v474_v30, 0.0 }
 0x4ba   :  { %v476_v33 = vadd.f32 1e-05, %v475_v34 }
 0x4bc   :  { %696 = vrsqrt.f32 %v476_v33 }
 0x4c6   :  { %v697_v21 = vpop.eup %696 }
 0x4c7   :  { %v478_v36 = vmul.f32 %v697_v21, %v1079_v56 }
 0x4c9   :  { %v482_v37 = vrot.slane %v478_v36, 4  ;;  %v479_v38 = vmul.f32 %v478_v36, %v471_v27 }
 0x4cb   :  { %v484_v39 = vsel %vm1321_vm15, %v478_v36, %v482_v37  ;;  %v480_v40 = vsub.f32 %v1085_v59, %v479_v38 }
 0x4cc   :  { %491 = vperm.xlu0 %657, %v484_v39  }
 0x4cd   :  { %v486_v42 = vrot.slane %v480_v40, 4 }
 0x4cf   :  { %v488_v43 = vsel %vm1322_vm1, %v480_v40, %v486_v42 }
 0x4d0   :  { %498 = vperm.xlu1 %658, %v488_v43  }
 0x54b   :  { %v492_v45 = vpop.permute.xlu0 %491 }
 0x54c   :  { %v494_v46 = vmul.f32 %v492_v45, %v450_v61  ;;  %v495_v47 = vmul.f32 %v492_v45, %v452_v10 }
 0x54f   :  { %v499_v48 = vpop.permute.xlu1 %498 }
 0x550   :  { %v501_v49 = vadd.f32 %v499_v48, %v494_v46  ;;  %v502_v50 = vadd.f32 %v499_v48, %v495_v47 }
 0x552   :  { %v503_v56 = vmax.f32 %v501_v49, 0.0  ;;  %v504_v17 = vmax.f32 %v502_v50, 0.0 }
 0x554   :  { %v505_v20 = vadd.f32 %v503_v56, %v795_v0  ;;  %v506_v51 = vadd.f32 %v504_v17, %v797_v1 }
 0x556   :  { %507 = vst [vmem:[#allocation5] sm:$0xff] %v505_v20  ;;  %508 = vst [vmem:[#allocation5 + $0x8] sm:$0xff] %v506_v51 }
 0x557   :  { %731 = shalt.err (!%p728_p12)
}
 0x558   :  { %s732_s16 = scalar_lea.hbm %s1199_s4, 256 }
 0x559   :  { %p733_p13 = scmp.ne.s32.totalorder %s1199_s4, %s732_s16  ;;  %p736_p0 = scmp.lt.u32.totalorder %s732_s16, %s1199_s4 }
 0x55b   :  { %p738_p1 = pnand %p736_p0, %p733_p13 }
 0x55d   :  { %741 = shalt.err (!%p738_p1)
}
 0x55e   :  { %518 = dma.vmem_to_hbm [thread:$0]  %s516_s3, 256, %s1199_s4, [#allocation4]  }
 0x55f   :  { %744 = dma.done.wait [#allocation4], 256  }
 0x560   :  { %745 = vsyncadd [#allocation4], 4294967040 }
 0x561   :  { %522 = vsyncpa [#allocation3], 1 }
 0x562   :  { %523 = vsyncpa [#allocation4], 1 }

</bundles_post_ra>
